<compile_context>
chip_gen: v6e
topology: v6e:2x2x1
jax: 0.10.0
libtpu: 0.0.40
codegen_flags: <defaults>
</compile_context>

<pallas_src>
import jax
import jax.numpy as jnp
from jax.experimental import pallas as pl
from jax.experimental.pallas import tpu as pltpu

PACK = 16  # samples packed per sublane row: (B, 6) -> (B/PACK, 6*PACK)


def titanic_mlp_kernel(x_ref, w1_ref, b1_ref, w2_ref, b2_ref, w3_ref, b3_ref, o_ref):
    x = x_ref[...]                                                        # (T, 96)

    # fc1 + ReLU  (block-diag W1^T: 96 -> 256, i.e. 16 packed samples x 16 hidden)
    h1 = jnp.dot(x, w1_ref[...], preferred_element_type=jnp.float32) + b1_ref[...]
    h1 = jnp.maximum(h1, 0.0)                                             # (T, 256)

    # fc2 + ReLU  (256 -> 128)
    h2 = jnp.dot(h1, w2_ref[...], preferred_element_type=jnp.float32) + b2_ref[...]
    h2 = jnp.maximum(h2, 0.0)                                             # (T, 128)

    # fc3 + Sigmoid  (128 -> 16, one scalar per packed sample)
    h3 = jnp.dot(h2, w3_ref[...], preferred_element_type=jnp.float32) + b3_ref[...]
    o_ref[...] = jax.nn.sigmoid(h3).astype(o_ref.dtype)                   # (T, 16)


def titanic_forward(x, params, *, tb=65536):
    """x: (B, 6) float32 -> (B, 1) float32, matching the PyTorch module.

    `tb` = target samples per grid step (default 64K; per-step HBM ~= 28*tb bytes).
    """
    w1, b1, w2, b2, w3, b3 = params
    B, F = x.shape
    assert F == 6

    # ---- adaptive, balanced tiling over packed rows (PACK samples per row) ----
    rows = pl.cdiv(B, PACK)
    # cap: 8192 rows = 128K samples/step -> VMEM working set ~21 MiB (safe on v7x's 64 MiB)
    tb_rows_target = min(max(8, tb // PACK), 8192)
    if rows <= tb_rows_target:
        tb_rows = rows                      # single full-extent block (any size allowed)
        n_blk = 1
    else:
        n_blk = pl.cdiv(rows, tb_rows_target)
        tb_rows = ((pl.cdiv(rows, n_blk) + 7) // 8) * 8   # balance tiles; sublane mult of 8
        n_blk = pl.cdiv(rows, tb_rows)
    rows_p = n_blk * tb_rows
    Bp = rows_p * PACK

    xf = x.astype(jnp.float32)
    if Bp != B:
        # Only pad when needed (choose B a multiple of PACK*tb_rows to avoid this copy).
        xf = jnp.pad(xf, ((0, Bp - B), (0, 0)))
    # Free row-major reshape: each row holds PACK consecutive samples' features.
    x_packed = xf.reshape(rows_p, PACK * 6)                               # (rows_p, 96)

    # ---- block-diagonal replication of the tiny weights (computed once, resident) ----
    eye = jnp.eye(PACK, dtype=jnp.float32)
    w1bd = jnp.kron(eye, w1.T.astype(jnp.float32))                        # (96, 256)
    w2bd = jnp.kron(eye, w2.T.astype(jnp.float32))                        # (256, 128)
    w3bd = jnp.kron(eye, w3.T.astype(jnp.float32))                        # (128, 16)
    b1t = jnp.tile(b1.astype(jnp.float32), PACK).reshape(1, -1)           # (1, 256)
    b2t = jnp.tile(b2.astype(jnp.float32), PACK).reshape(1, -1)           # (1, 128)
    b3t = jnp.tile(b3.astype(jnp.float32), PACK).reshape(1, -1)           # (1, 16)

    # ---- explicit VMEM budget (per grid step) ----
    # x dbuf: 2 * T * 128(lane-pad of 96) * 4 ; out dbuf: 2 * T * 128(lane-pad of 16) * 4
    # h1: T*256*4 ; h2: T*128*4 ; + resident block-diag weights/biases (x2 buffers).
    w_bytes = 4 * (w1bd.size + b1t.size + w2bd.size + b2t.size + w3bd.size + b3t.size)
    vmem_est = tb_rows * (2 * 128 + 2 * 128 + 256 + 128) * 4 + 2 * int(w_bytes) + (1 << 20)
    vmem_limit = int(min(max(vmem_est * 3 // 2, 32 << 20), 56 << 20))     # < v7x 64 MiB phys

    # ---- advisory cost (actual padded/block-diag work) ----
    cost = pl.CostEstimate(
        flops=2 * rows_p * (96 * 256 + 256 * 128 + 128 * 16),
        transcendentals=rows_p * PACK,                                    # sigmoid
        bytes_accessed=rows_p * (96 + 16) * 4 + int(w_bytes),
    )

    const = lambda shape: pl.BlockSpec(shape, lambda i: (0, 0))           # resident blocks

    out_packed = pl.pallas_call(
        titanic_mlp_kernel,
        out_shape=jax.ShapeDtypeStruct((rows_p, PACK), jnp.float32),
        grid=(n_blk,),
        in_specs=[
            pl.BlockSpec((tb_rows, PACK * 6), lambda i: (i, 0)),          # x tile
            const(w1bd.shape), const(b1t.shape),
            const(w2bd.shape), const(b2t.shape),
            const(w3bd.shape), const(b3t.shape),
        ],
        out_specs=pl.BlockSpec((tb_rows, PACK), lambda i: (i, 0)),
        compiler_params=pltpu.CompilerParams(
            dimension_semantics=("parallel",),      # shard batch across v7x's 2 TCs
            vmem_limit_bytes=vmem_limit,
        ),
        cost_estimate=cost,
    )(x_packed, w1bd, b1t, w2bd, b2t, w3bd, b3t)

    # Free row-major reshape back to one scalar per sample; drop padded samples.
    return out_packed.reshape(Bp, 1)[:B]


def init_params(key):
    """Deterministic init mirroring nn.Linear: weight [out, in], bias (out,)."""
    ks = jax.random.split(key, 6)

    def linear(kw, kb, fan_in, fan_out):
        bound = 1.0 / jnp.sqrt(jnp.float32(fan_in))
        w = jax.random.uniform(kw, (fan_out, fan_in), jnp.float32, -bound, bound)
        b = jax.random.uniform(kb, (fan_out,), jnp.float32, -bound, bound)
        return w, b

    w1, b1 = linear(ks[0], ks[1], 6, 16)
    w2, b2 = linear(ks[2], ks[3], 16, 8)
    w3, b3 = linear(ks[4], ks[5], 8, 1)
    return (w1, b1, w2, b2, w3, b3)


def reference_forward(x, params):
    w1, b1, w2, b2, w3, b3 = params
    h = jax.nn.relu(x @ w1.T + b1)
    h = jax.nn.relu(h @ w2.T + b2)
    return jax.nn.sigmoid(h @ w3.T + b3)


if __name__ == "__main__":
    key = jax.random.PRNGKey(0)
    k_x, k_x2, k_x3, k_p = jax.random.split(key, 4)
    params = init_params(k_p)

    # 1) Small smoke test (single block, B < PACK exercises the padded path).
    batch = 8
    x = jax.random.normal(k_x, (batch, 6), dtype=jnp.float32)
    out = jax.block_until_ready(titanic_forward(x, params))
    ref = reference_forward(x, params)
    assert out.shape == (batch, 1)
    assert jnp.allclose(out, ref, atol=1e-5, rtol=1e-5)

    # 2) Multi-block, zero-padding path (4096 samples, 2 grid steps at tb=2048).
    batch2 = 4096
    x2 = jax.random.normal(k_x2, (batch2, 6), dtype=jnp.float32)
    out2 = jax.block_until_ready(titanic_forward(x2, params, tb=2048))
    ref2 = reference_forward(x2, params)
    assert out2.shape == (batch2, 1)
    assert jnp.allclose(out2, ref2, atol=1e-5, rtol=1e-5)

    # 3) Multi-block with ragged batch (padding + balanced tiles exercised).
    batch3 = 5000
    x3 = jax.random.normal(k_x3, (batch3, 6), dtype=jnp.float32)
    out3 = jax.block_until_ready(titanic_forward(x3, params, tb=2048))
    ref3 = reference_forward(x3, params)
    assert out3.shape == (batch3, 1)
    assert jnp.allclose(out3, ref3, atol=1e-5, rtol=1e-5)

    print("KERNEL_OK")
</pallas_src>

<mosaic_0001>
module attributes {stable_mosaic.version = 11 : i64} {
  func.func @titanic_mlp_kernel(%arg0: i32, %arg1: memref<1x96xf32, #tpu.memory_space<vmem>>, %arg2: memref<96x256xf32, #tpu.memory_space<vmem>>, %arg3: memref<1x256xf32, #tpu.memory_space<vmem>>, %arg4: memref<256x128xf32, #tpu.memory_space<vmem>>, %arg5: memref<1x128xf32, #tpu.memory_space<vmem>>, %arg6: memref<128x16xf32, #tpu.memory_space<vmem>>, %arg7: memref<1x16xf32, #tpu.memory_space<vmem>>, %arg8: memref<1x16xf32, #tpu.memory_space<vmem>>) attributes {dimension_semantics = [#tpu.dimension_semantics<parallel>], iteration_bounds = array<i64: 1>, scalar_prefetch = 0 : i64, scratch_operands = 0 : i64, tpu.core_type = #tpu.core_type<tc>, window_params = [{transform_indices = @transform_0, window_bounds = array<i64: 1, 96>}, {pipeline_mode = #tpu.pipeline_mode<synchronous>, transform_indices = @transform_1, window_bounds = array<i64: 96, 256>}, {pipeline_mode = #tpu.pipeline_mode<synchronous>, transform_indices = @transform_2, window_bounds = array<i64: 1, 256>}, {pipeline_mode = #tpu.pipeline_mode<synchronous>, transform_indices = @transform_3, window_bounds = array<i64: 256, 128>}, {pipeline_mode = #tpu.pipeline_mode<synchronous>, transform_indices = @transform_4, window_bounds = array<i64: 1, 128>}, {pipeline_mode = #tpu.pipeline_mode<synchronous>, transform_indices = @transform_5, window_bounds = array<i64: 128, 16>}, {pipeline_mode = #tpu.pipeline_mode<synchronous>, transform_indices = @transform_6, window_bounds = array<i64: 1, 16>}, {transform_indices = @transform_7, window_bounds = array<i64: 1, 16>}]} {
    %c0 = arith.constant 0 : index
    %c0_0 = arith.constant 0 : index
    %0 = vector.load %arg1[%c0, %c0_0] : memref<1x96xf32, #tpu.memory_space<vmem>>, vector<1x96xf32>
    %c0_1 = arith.constant 0 : index
    %c0_2 = arith.constant 0 : index
    %1 = vector.load %arg2[%c0_1, %c0_2] : memref<96x256xf32, #tpu.memory_space<vmem>>, vector<96x256xf32>
    %cst = arith.constant dense<0.000000e+00> : vector<1x256xf32>
    %2 = tpu.matmul %0, %1, %cst {dimension_numbers = #tpu.dot_dimension_numbers<[1], [0], [0], [1], [0, 0, 1, 1], [], []>} : vector<1x96xf32>, vector<96x256xf32>, vector<1x256xf32> -> vector<1x256xf32>
    %c0_3 = arith.constant 0 : index
    %c0_4 = arith.constant 0 : index
    %3 = vector.load %arg3[%c0_3, %c0_4] : memref<1x256xf32, #tpu.memory_space<vmem>>, vector<1x256xf32>
    %4 = arith.addf %2, %3 : vector<1x256xf32>
    %cst_5 = arith.constant 0.000000e+00 : f32
    %5 = vector.broadcast %cst_5 : f32 to vector<1x256xf32>
    %6 = arith.maximumf %4, %5 : vector<1x256xf32>
    %c0_6 = arith.constant 0 : index
    %c0_7 = arith.constant 0 : index
    %7 = vector.load %arg4[%c0_6, %c0_7] : memref<256x128xf32, #tpu.memory_space<vmem>>, vector<256x128xf32>
    %cst_8 = arith.constant dense<0.000000e+00> : vector<1x128xf32>
    %8 = tpu.matmul %6, %7, %cst_8 {dimension_numbers = #tpu.dot_dimension_numbers<[1], [0], [0], [1], [0, 0, 1, 1], [], []>} : vector<1x256xf32>, vector<256x128xf32>, vector<1x128xf32> -> vector<1x128xf32>
    %c0_9 = arith.constant 0 : index
    %c0_10 = arith.constant 0 : index
    %9 = vector.load %arg5[%c0_9, %c0_10] : memref<1x128xf32, #tpu.memory_space<vmem>>, vector<1x128xf32>
    %10 = arith.addf %8, %9 : vector<1x128xf32>
    %cst_11 = arith.constant 0.000000e+00 : f32
    %11 = vector.broadcast %cst_11 : f32 to vector<1x128xf32>
    %12 = arith.maximumf %10, %11 : vector<1x128xf32>
    %c0_12 = arith.constant 0 : index
    %c0_13 = arith.constant 0 : index
    %13 = vector.load %arg6[%c0_12, %c0_13] : memref<128x16xf32, #tpu.memory_space<vmem>>, vector<128x16xf32>
    %cst_14 = arith.constant dense<0.000000e+00> : vector<1x16xf32>
    %14 = tpu.matmul %12, %13, %cst_14 {dimension_numbers = #tpu.dot_dimension_numbers<[1], [0], [0], [1], [0, 0, 1, 1], [], []>} : vector<1x128xf32>, vector<128x16xf32>, vector<1x16xf32> -> vector<1x16xf32>
    %c0_15 = arith.constant 0 : index
    %c0_16 = arith.constant 0 : index
    %15 = vector.load %arg7[%c0_15, %c0_16] : memref<1x16xf32, #tpu.memory_space<vmem>>, vector<1x16xf32>
    %16 = arith.addf %14, %15 : vector<1x16xf32>
    %17 = arith.negf %16 : vector<1x16xf32>
    %18 = math.exp %17 : vector<1x16xf32>
    %cst_17 = arith.constant 1.000000e+00 : f32
    %19 = vector.broadcast %cst_17 : f32 to vector<1x16xf32>
    %20 = arith.addf %19, %18 : vector<1x16xf32>
    %21 = arith.divf %19, %20 : vector<1x16xf32>
    %c0_18 = arith.constant 0 : index
    %c0_19 = arith.constant 0 : index
    %22 = vector.load %arg8[%c0_18, %c0_19] : memref<1x16xf32, #tpu.memory_space<vmem>>, vector<1x16xf32>
    tpu.vector_store %arg8[%c0_18, %c0_19], %21 {strides = array<i32>} : memref<1x16xf32, #tpu.memory_space<vmem>>, vector<1x16xf32>,
    return
  }
  func.func @transform_0(%arg0: i32) -> (i32, i32) {
    %c0_i32 = arith.constant 0 : i32
    %c0_i32_0 = arith.constant 0 : i32
    return %arg0, %c0_i32 : i32, i32
  }
  func.func @transform_1(%arg0: i32) -> (i32, i32) {
    %c0_i32 = arith.constant 0 : i32
    %c0_i32_0 = arith.constant 0 : i32
    %c0_i32_1 = arith.constant 0 : i32
    return %c0_i32, %c0_i32_0 : i32, i32
  }
  func.func @transform_2(%arg0: i32) -> (i32, i32) {
    %c0_i32 = arith.constant 0 : i32
    %c0_i32_0 = arith.constant 0 : i32
    %c0_i32_1 = arith.constant 0 : i32
    return %c0_i32, %c0_i32_0 : i32, i32
  }
  func.func @transform_3(%arg0: i32) -> (i32, i32) {
    %c0_i32 = arith.constant 0 : i32
    %c0_i32_0 = arith.constant 0 : i32
    %c0_i32_1 = arith.constant 0 : i32
    return %c0_i32, %c0_i32_0 : i32, i32
  }
  func.func @transform_4(%arg0: i32) -> (i32, i32) {
    %c0_i32 = arith.constant 0 : i32
    %c0_i32_0 = arith.constant 0 : i32
    %c0_i32_1 = arith.constant 0 : i32
    return %c0_i32, %c0_i32_0 : i32, i32
  }
  func.func @transform_5(%arg0: i32) -> (i32, i32) {
    %c0_i32 = arith.constant 0 : i32
    %c0_i32_0 = arith.constant 0 : i32
    %c0_i32_1 = arith.constant 0 : i32
    return %c0_i32, %c0_i32_0 : i32, i32
  }
  func.func @transform_6(%arg0: i32) -> (i32, i32) {
    %c0_i32 = arith.constant 0 : i32
    %c0_i32_0 = arith.constant 0 : i32
    %c0_i32_1 = arith.constant 0 : i32
    return %c0_i32, %c0_i32_0 : i32, i32
  }
  func.func @transform_7(%arg0: i32) -> (i32, i32) {
    %c0_i32 = arith.constant 0 : i32
    %c0_i32_0 = arith.constant 0 : i32
    return %arg0, %c0_i32 : i32, i32
  }
}

</mosaic_0001>

<bundles_post_ra>
// kernel: tpu_custom_call.1
= control target key start
LH: loop header
LB: loop body
LE: loop exit
PB: predicated region body
PF: predicated region fallthrough
CT: control target
= control target key end

     0   :  { %12 = vsyncpa [#allocation3], 0  ;;  %s688_s0 = inlined_call_operand.vmem [shape: f32[1,96], index: 0, kind: input, shape index: {}]   ;;  %s689_s1 = inlined_call_operand.hbm [shape: f32[96,256], index: 1, kind: input, shape index: {}]   ;;  %s690_s2 = inlined_call_operand.vmem [shape: f32[1,256], index: 2, kind: input, shape index: {}]   ;;  %s691_s3 = inlined_call_operand.hbm [shape: f32[256,128], index: 3, kind: input, shape index: {}]   ;;  %s692_s4 = inlined_call_operand.vmem [shape: f32[1,128], index: 4, kind: input, shape index: {}]   ;;  %s693_s5 = inlined_call_operand.vmem [shape: f32[128,16], index: 5, kind: input, shape index: {}]   ;;  %s694_s6 = inlined_call_operand.vmem [shape: f32[1,16], index: 6, kind: input, shape index: {}]   ;;  %s695_s7 = inlined_call_operand.hbm [shape: f32[1,16], index: 7, kind: output, shape index: {}]  }
   0x1   :  { %13 = vsyncpa [#allocation6], 0 }
   0x2   :  { %14 = vsyncpa [#allocation4], 0  ;;  %s552_s24 = smov [#allocation2]  }
   0x3   :  { %s22_s25 = sshll.u32 %s552_s24, 4  ;;  %s23_s25 = int_to_ptr.vmem [resolvable:$true] %s22_s25 }
   0x4   :  { %s494_s26 = scalar_lea.vmem %s23_s25, 3072  ;;  %p499_p1 = scmp.lt.s32.totalorder %s23_s25, %s23_s25 }
   0x5   :  { %p495_p0 = scmp.ne.s32.totalorder %s23_s25, %s494_s26  ;;  %p500_p2 = scmp.lt.s32.totalorder %s494_s26, %s494_s26 }
   0x7   :  { %p501_p3 = por %p500_p2, %p499_p1 }
   0x9   :  { %p502_p4 = pnand %p501_p3, %p495_p0 }
   0xb   :  { %505 = shalt.err (!%p502_p4)
}
   0xc   :  { %s553_s27 = smov 256   ;;  %s554_s28 = smov 16  }
   0xd   :  { %28 = dma.hbm_to_vmem [thread:$0]  %s689_s1, 3072, %s23_s25, [#allocation3], %s553_s27, %s553_s27, %s554_s28  }
   0xe   :  { %s555_s8 = smov [#allocation5]  }
   0xf   :  { %s36_s9 = sshll.u32 %s555_s8, 4  ;;  %s37_s9 = int_to_ptr.vmem [resolvable:$true] %s36_s9 }
  0x10   :  { %s514_s10 = scalar_lea.vmem %s37_s9, 4096  ;;  %p519_p6 = scmp.lt.s32.totalorder %s37_s9, %s37_s9 }
  0x11   :  { %p515_p5 = scmp.ne.s32.totalorder %s37_s9, %s514_s10  ;;  %p520_p7 = scmp.lt.s32.totalorder %s514_s10, %s514_s10 }
  0x13   :  { %p521_p8 = por %p520_p7, %p519_p6 }
  0x15   :  { %p522_p9 = pnand %p521_p8, %p515_p5 }
  0x17   :  { %525 = shalt.err (!%p522_p9)
}
  0x18   :  { %s556_s11 = smov 128   ;;  %s557_s12 = smov 8  }
  0x19   :  { %42 = dma.hbm_to_vmem [thread:$0]  %s691_s3, 4096, %s37_s9, [#allocation6], %s556_s11, %s556_s11, %s557_s12  }
  0x1a   :  { %546 = dma.done.wait [#allocation3], 3072  }
  0x1b   :  { %547 = vsyncadd [#allocation3], 4294964224 }
  0x1c   :  { %548 = dma.done.wait [#allocation6], 4096  }
  0x1d   :  { %549 = vsyncadd [#allocation6], 4294963200  ;;  %v558_v0 = vmov 0.0   ;;  %v79_v1 = vld [vmem:[#allocation2 + $0xb8] sm:$0xff]  ;;  %v78_v2 = vld [vmem:[#allocation2 + $0xb0] sm:$0xff]  ;;  %vm92_vm0 = vcmask 785408  }
  0x1e   :  { %160 = vmatprep.mubr.f32.mxu0 %v558_v0  ;;  %v77_v3 = vld [vmem:[#allocation2 + $0xa8] sm:$0xff]  ;;  %104 = vmatprep.subr.mxu0 %v79_v1  ;;  %v76_v4 = vld [vmem:[#allocation2 + $0xa0] sm:$0xff]  ;;  %v75_v5 = vld [vmem:[#allocation2 + $0x98] sm:$0xff]  ;;  %vm559_vm1 = vmmov 0   ;;  %vm366_vm2 = vcmask 122880  }
  0x1f   :  { %105 = vmatpush1.msra.mxu0 %v78_v2  ;;  %v74_v6 = vld [vmem:[#allocation2 + $0x90] sm:$0xff]  ;;  %v73_v7 = vld [vmem:[#allocation2 + $0x88] sm:$0xff]  ;;  %v72_v8 = vld [vmem:[#allocation2 + $0x80] sm:$0xff] }
  0x20   :  { %106 = vmatprep.subr.mxu0 %v77_v3  ;;  %v71_v9 = vld [vmem:[#allocation2 + $0x78] sm:$0xff]  ;;  %v70_v10 = vld [vmem:[#allocation2 + $0x70] sm:$0xff]  ;;  %v69_v11 = vld [vmem:[#allocation2 + $0x68] sm:$0xff] }
  0x21   :  { %107 = vmatpush1.msra.mxu0 %v76_v4  ;;  %v200_v12 = vld [vmem:[#allocation5 + $0xf8] sm:$0xff]  ;;  %v68_v14 = vld [vmem:[#allocation2 + $0x60] sm:$0xff]  ;;  %v199_v15 = vld [vmem:[#allocation5 + $0xf0] sm:$0xff] }
  0x22   :  { %108 = vmatprep.subr.mxu0 %v75_v5  ;;  %v184_v13 = vld [vmem:[#allocation5 + $0x78] sm:$0xff]  ;;  %386 = vmatprep.subr.mxu1 %v200_v12  ;;  %v183_v16 = vld [vmem:[#allocation5 + $0x70] sm:$0xff]  ;;  %v198_v18 = vld [vmem:[#allocation5 + $0xe8] sm:$0xff] }
  0x23   :  { %109 = vmatpush1.msra.mxu0 %v74_v6  ;;  %v67_v17 = vld [vmem:[#allocation2 + $0x58] sm:$0xff]  ;;  %387 = vmatpush3.msra.mxu1 %v184_v13  ;;  %v66_v19 = vld [vmem:[#allocation2 + $0x50] sm:$0xff]  ;;  %v182_v20 = vld [vmem:[#allocation5 + $0x68] sm:$0xff]  ;;  %v82_v6 = vlaneseq }
  0x24   :  { %110 = vmatprep.subr.mxu0 %v73_v7  ;;  %388 = vmatprep.subr.mxu1 %v199_v15  ;;  %v65_v21 = vld [vmem:[#allocation2 + $0x48] sm:$0xff]  ;;  %v197_v22 = vld [vmem:[#allocation5 + $0xe0] sm:$0xff]  ;;  %v63_v25 = vld [vmem:[#allocation2 + $0x38] sm:$0xff] }
  0x25   :  { %111 = vmatpush1.msra.mxu0 %v72_v8  ;;  %389 = vmatpush3.msra.mxu1 %v183_v16  ;;  %v64_v23 = vld [vmem:[#allocation2 + $0x40] sm:$0xff]  ;;  %v196_v26 = vld [vmem:[#allocation5 + $0xd8] sm:$0xff]  ;;  %v62_v27 = vld [vmem:[#allocation2 + $0x30] sm:$0xff]  ;;  %v83_v7 = vshrl.u32 %v82_v6, 7 }
  0x26   :  { %112 = vmatprep.subr.mxu0 %v71_v9  ;;  %390 = vmatprep.subr.mxu1 %v198_v18  ;;  %v181_v24 = vld [vmem:[#allocation5 + $0x60] sm:$0xff]  ;;  %v180_v28 = vld [vmem:[#allocation5 + $0x58] sm:$0xff]  ;;  %v61_v29 = vld [vmem:[#allocation2 + $0x28] sm:$0xff] }
  0x27   :  { %113 = vmatpush1.msra.mxu0 %v70_v10  ;;  %391 = vmatpush3.msra.mxu1 %v182_v20  ;;  %v195_v30 = vld [vmem:[#allocation5 + $0xd0] sm:$0xff]  ;;  %v60_v31 = vld [vmem:[#allocation2 + $0x20] sm:$0xff]  ;;  %v59_v33 = vld [vmem:[#allocation2 + $0x18] sm:$0xff]  ;;  %v84_v8 = vsub.s32 0, %v83_v7  ;;  %v88_v10 = vsub.s32 1, %v83_v7 }
  0x28   :  { %114 = vmatprep.subr.mxu0 %v69_v11  ;;  %392 = vmatprep.subr.mxu1 %v197_v22  ;;  %v179_v32 = vld [vmem:[#allocation5 + $0x50] sm:$0xff]  ;;  %v194_v34 = vld [vmem:[#allocation5 + $0xc8] sm:$0xff]  ;;  %v193_v38 = vld [vmem:[#allocation5 + $0xc0] sm:$0xff] }
  0x29   :  { %115 = vmatpush1.msra.mxu0 %v68_v14  ;;  %393 = vmatpush3.msra.mxu1 %v181_v24  ;;  %v58_v35 = vld [vmem:[#allocation2 + $0x10] sm:$0xff]  ;;  %v178_v36 = vld [vmem:[#allocation5 + $0x48] sm:$0xff]  ;;  %v56_v39 = vld [vmem:[#allocation2] sm:$0xff] }
  0x2a   :  { %116 = vmatprep.subr.mxu0 %v67_v17  ;;  %394 = vmatprep.subr.mxu1 %v196_v26  ;;  %v57_v37 = vld [vmem:[#allocation2 + $0x8] sm:$0xff]  ;;  %v177_v40 = vld [vmem:[#allocation5 + $0x40] sm:$0xff]  ;;  %v192_v42 = vld [vmem:[#allocation5 + $0xb8] sm:$0xff] }
  0x2b   :  { %117 = vmatpush1.msra.mxu0 %v66_v19  ;;  %395 = vmatpush3.msra.mxu1 %v180_v28  ;;  %v55_v41 = vld [vmem:[%s688_s0] sm:$0x1]  ;;  %v176_v43 = vld [vmem:[#allocation5 + $0x38] sm:$0xff]  ;;  %v191_v44 = vld [vmem:[#allocation5 + $0xb0] sm:$0xff] }
  0x2c   :  { %118 = vmatprep.subr.mxu0 %v65_v21  ;;  %396 = vmatprep.subr.mxu1 %v195_v30  ;;  %v175_v45 = vld [vmem:[#allocation5 + $0x30] sm:$0xff]  ;;  %v190_v46 = vld [vmem:[#allocation5 + $0xa8] sm:$0xff]  ;;  %v189_v48 = vld [vmem:[#allocation5 + $0xa0] sm:$0xff] }
  0x2d   :  { %119 = vmatpush1.msra.mxu0 %v64_v23  ;;  %397 = vmatpush3.msra.mxu1 %v179_v32  ;;  %v174_v47 = vld [vmem:[#allocation5 + $0x28] sm:$0xff]  ;;  %v173_v49 = vld [vmem:[#allocation5 + $0x20] sm:$0xff]  ;;  %v188_v50 = vld [vmem:[#allocation5 + $0x98] sm:$0xff] }
  0x2e   :  { %120 = vmatprep.subr.mxu0 %v63_v25  ;;  %398 = vmatprep.subr.mxu1 %v194_v34  ;;  %v172_v51 = vld [vmem:[#allocation5 + $0x18] sm:$0xff]  ;;  %v187_v52 = vld [vmem:[#allocation5 + $0x90] sm:$0xff]  ;;  %v186_v54 = vld [vmem:[#allocation5 + $0x88] sm:$0xff] }
  0x2f   :  { %121 = vmatpush1.msra.mxu0 %v62_v27  ;;  %399 = vmatpush3.msra.mxu1 %v178_v36  ;;  %v171_v53 = vld [vmem:[#allocation5 + $0x10] sm:$0xff]  ;;  %v170_v55 = vld [vmem:[#allocation5 + $0x8] sm:$0xff]  ;;  %v185_v56 = vld [vmem:[#allocation5 + $0x80] sm:$0xff] }
  0x30   :  { %122 = vmatprep.subr.mxu0 %v61_v29  ;;  %400 = vmatprep.subr.mxu1 %v193_v38  ;;  %v169_v57 = vld [vmem:[#allocation5] sm:$0xff]  ;;  %v288_v58 = vld [vmem:[%s693_s5 + $0x78] sm:$0xff]  ;;  %v287_v59 = vld [vmem:[%s693_s5 + $0x70] sm:$0xff] }
  0x31   :  { %123 = vmatpush1.msra.mxu0 %v60_v31  ;;  %401 = vmatpush3.msra.mxu1 %v177_v40  ;;  %v286_v60 = vld [vmem:[%s693_s5 + $0x68] sm:$0xff]  ;;  %v285_v61 = vld [vmem:[%s693_s5 + $0x60] sm:$0xff]  ;;  %v284_v62 = vld [vmem:[%s693_s5 + $0x58] sm:$0xff] }
  0x32   :  { %124 = vmatprep.subr.mxu0 %v59_v33  ;;  %402 = vmatprep.subr.mxu1 %v192_v42  ;;  %v283_v63 = vld [vmem:[%s693_s5 + $0x50] sm:$0xff]  ;;  %v282_v1 = vld [vmem:[%s693_s5 + $0x48] sm:$0xff]  ;;  %v281_v2 = vld [vmem:[%s693_s5 + $0x40] sm:$0xff] }
  0x33   :  { %125 = vmatpush1.msra.mxu0 %v58_v35  ;;  %403 = vmatpush3.msra.mxu1 %v176_v43  ;;  %v280_v3 = vld [vmem:[%s693_s5 + $0x38] sm:$0xff]  ;;  %v279_v4 = vld [vmem:[%s693_s5 + $0x30] sm:$0xff]  ;;  %v278_v5 = vld [vmem:[%s693_s5 + $0x28] sm:$0xff] }
  0x34   :  { %126 = vmatprep.subr.mxu0 %v57_v37  ;;  %404 = vmatprep.subr.mxu1 %v191_v44  ;;  %v80_v9 = vld [vmem:[%s690_s2] sm:$0x3]  ;;  %v276_v20 = vld [vmem:[%s693_s5 + $0x18] sm:$0xff]  ;;  %v275_v21 = vld [vmem:[%s693_s5 + $0x10] sm:$0xff] }
  0x35   :  { %127 = vmatpush1.msra.mxu0 %v56_v39  ;;  %405 = vmatpush3.msra.mxu1 %v175_v45  ;;  %v85_v11 = vrot.slane %v80_v9, %v84_v8  ;;  %v89_v12 = vrot.slane %v80_v9, %v88_v10  ;;  %v277_v19 = vld [vmem:[%s693_s5 + $0x20] sm:$0xff]  ;;  %v274_v22 = vld [vmem:[%s693_s5 + $0x8] sm:$0xff] }
  0x36   :  { %384 = vmatmul.mubr.msk.f32.vlgmr.msra.gmra.mxu0 %vm92_vm0, %v55_v41  ;;  %438 = vmatprep.subr.mxu0 %v558_v0  ;;  %v273_v23 = vld [vmem:[%s693_s5] sm:$0xff]  ;;  %s560_s5 = smov [#allocation7]  }
  0x37   :  { %406 = vmatprep.subr.mxu1 %v190_v46  ;;  %439 = vmatpush3.msra.mxu0 %v288_v58  ;;  %v201_v25 = vld [vmem:[%s692_s4] sm:$0x1]  ;;  %s374_s25 = sshll.u32 %s560_s5, 4  ;;  %s375_s25 = int_to_ptr.vmem [resolvable:$true] %s374_s25 }
  0x38   :  { %407 = vmatpush3.msra.mxu1 %v174_v47  ;;  %440 = vmatprep.subr.mxu0 %v558_v0  ;;  %v289_v30 = vld [vmem:[%s694_s6] sm:$0x1]  ;;  %s526_s4 = scalar_lea.vmem %s375_s25, 16  ;;  %s530_s26 = scalar_lea.vmem %s375_s25, 32 }
  0x39   :  { %408 = vmatprep.subr.mxu1 %v189_v48  ;;  %441 = vmatpush3.msra.mxu0 %v287_v59  ;;  %p527_p10 = scmp.ne.s32.totalorder %s375_s25, %s526_s4  ;;  %p531_p11 = scmp.lt.s32.totalorder %s375_s25, %s375_s25 }
  0x3a   :  { %409 = vmatpush3.msra.mxu1 %v173_v49  ;;  %442 = vmatprep.subr.mxu0 %v558_v0  ;;  %p532_p12 = scmp.lt.s32.totalorder %s530_s26, %s526_s4 }
  0x3b   :  { %410 = vmatprep.subr.mxu1 %v188_v50  ;;  %443 = vmatpush3.msra.mxu0 %v286_v60 }
  0x3c   :  { %411 = vmatpush3.msra.mxu1 %v172_v51  ;;  %444 = vmatprep.subr.mxu0 %v558_v0  ;;  %p533_p13 = por %p532_p12, %p531_p11 }
  0x3d   :  { %412 = vmatprep.subr.mxu1 %v187_v52  ;;  %445 = vmatpush3.msra.mxu0 %v285_v61 }
  0x3e   :  { %413 = vmatpush3.msra.mxu1 %v171_v53  ;;  %446 = vmatprep.subr.mxu0 %v558_v0  ;;  %p534_p0 = pnand %p533_p13, %p527_p10 }
  0x3f   :  { %414 = vmatprep.subr.mxu1 %v186_v54  ;;  %447 = vmatpush3.msra.mxu0 %v284_v62 }
  0x40   :  { %415 = vmatpush3.msra.mxu1 %v170_v55  ;;  %448 = vmatprep.subr.mxu0 %v558_v0 }
  0x41   :  { %416 = vmatprep.subr.mxu1 %v185_v56  ;;  %449 = vmatpush3.msra.mxu0 %v283_v63 }
  0x42   :  { %417 = vmatpush3.msra.mxu1 %v169_v57  ;;  %450 = vmatprep.subr.mxu0 %v558_v0 }
  0x43   :  { %451 = vmatpush3.msra.mxu0 %v282_v1  ;;  %470 = vmatprep.mubr.msk.f32.mxu0 %vm559_vm1, %v558_v0 }
  0x44   :  { %452 = vmatprep.subr.mxu0 %v558_v0 }
  0x45   :  { %453 = vmatpush3.msra.mxu0 %v281_v2 }
  0x46   :  { %454 = vmatprep.subr.mxu0 %v558_v0 }
  0x47   :  { %455 = vmatpush3.msra.mxu0 %v280_v3 }
  0x48   :  { %456 = vmatprep.subr.mxu0 %v558_v0 }
  0x49   :  { %457 = vmatpush3.msra.mxu0 %v279_v4 }
  0x4a   :  { %458 = vmatprep.subr.mxu0 %v558_v0 }
  0x4b   :  { %459 = vmatpush3.msra.mxu0 %v278_v5 }
  0x4c   :  { %460 = vmatprep.subr.mxu0 %v558_v0 }
  0x4d   :  { %461 = vmatpush3.msra.mxu0 %v277_v19 }
  0x4e   :  { %462 = vmatprep.subr.mxu0 %v558_v0 }
  0x4f   :  { %463 = vmatpush3.msra.mxu0 %v276_v20 }
  0x50   :  { %464 = vmatprep.subr.mxu0 %v558_v0 }
  0x51   :  { %465 = vmatpush3.msra.mxu0 %v275_v21 }
  0x52   :  { %466 = vmatprep.subr.mxu0 %v558_v0 }
  0x53   :  { %467 = vmatpush3.msra.mxu0 %v274_v22 }
  0x54   :  { %468 = vmatprep.subr.mxu0 %v558_v0 }
  0x55   :  { %469 = vmatpush3.msra.mxu0 %v273_v23 }
  0xf6   :  { %v162_v13 = vpop.f32.mrf.mxu0 }
  0xf7   :  { %v163_v14 = vadd.f32 %v162_v13, %v85_v11 }
  0xf8   :  { %v164_v15 = vpop.f32.mrf.mxu0 }
  0xf9   :  { %v165_v16 = vadd.f32 %v164_v15, %v89_v12  ;;  %v167_v18 = vmax.f32 %v163_v14, 0.0 }
  0xfb   :  { %v168_v17 = vmax.f32 %v165_v16, 0.0 }
  0xfd   :  { %266 = vmatprep.mubr.f32.mxu1 %v168_v17 }
  0xfe   :  { %267 = vmatmul.mubr.f32.vlgmr.msra.gmra.mxu1 %v167_v18 }
 0x1be   :  { %v418_v24 = vpop.f32.mrf.mxu1 }
 0x1c0   :  { %v419_v26 = vpop.f32.mrf.mxu1 }
 0x1c1   :  { %v420_v27 = vadd.f32 %v419_v26, %v418_v24 }
 0x1c3   :  { %v269_v28 = vadd.f32 %v420_v27, %v201_v25 }
 0x1c5   :  { %v272_v29 = vmax.f32 %v269_v28, 0.0 }
 0x1c7   :  { %471 = vmatmul.mubr.f32.vlgmr.msra.gmra.mxu0 %v272_v29 }
 0x287   :  { %v356_v31 = vpop.f32.mrf.mxu0 }
 0x288   :  { %v357_v32 = vadd.f32 %v356_v31, %v289_v30 }
 0x289   :  { %v472_v33 = vpop.f32.mrf.mxu0 }
 0x28a   :  { %v385_v34 = vmul.f32 -1.442695, %v357_v32 }
 0x28c   :  { %482 = vpow2.f32 %v385_v34 }
 0x299   :  { %v483_v0 = vpop.eup %482 }
 0x29a   :  { %v363_v35 = vadd.f32 1.0, %v483_v0 }
 0x29c   :  { %484 = vrcp.f32 %v363_v35 }
 0x2a9   :  { %v485_v36 = vpop.eup %484 }
 0x2aa   :  { %367 = vst.msk [vmem:[#allocation7] sm:$0x1] %vm366_vm2, %v485_v36 }
 0x2ab   :  { %537 = shalt.err (!%p534_p0)
}
 0x2ac   :  { %377 = dma.vmem_to_hbm [thread:$0]  %s375_s25, 16, %s695_s7, [#allocation4]  }
 0x2ad   :  { %550 = dma.done.wait [#allocation4], 16  }
 0x2ae   :  { %551 = vsyncadd [#allocation4], 4294967280 }
 0x2af   :  { %381 = vsyncpa [#allocation3], 1 }
 0x2b0   :  { %382 = vsyncpa [#allocation6], 1 }
 0x2b1   :  { %383 = vsyncpa [#allocation4], 1 }

</bundles_post_ra>
